<compile_context>
chip_gen: v7x
topology: tpu7x:2x2x1
jax: 0.10.0
libtpu: 0.0.40
codegen_flags: <defaults>
</compile_context>

<pallas_src>
import functools

import jax
import jax.numpy as jnp
from jax.experimental import pallas as pl
from jax.experimental.pallas import tpu as pltpu


_LANE = 128
_MIB = 1024 * 1024


def _round_up(x, m):
    return (x + m - 1) // m * m


def _vmem_budget_bytes():
    """Generation-aware VMEM budget: physical capacity minus headroom."""
    try:
        cap = int(pltpu.get_tpu_info().vmem_capacity_bytes)
    except Exception:
        cap = 64 * _MIB  # conservative fallback (v7x-sized)
    # ~48 MiB on v7x (64 MiB physical), ~100 MiB on v5e/v6e (128 MiB).
    return max(32 * _MIB, min(cap - 16 * _MIB, 100 * _MIB))


def _vmem_bytes(tm, th, C_pad, O_pad, out_itemsize):
    """Estimated VMEM footprint for one grid step (2-deep pipelining)."""
    db = 2  # default double-buffering of pipelined inputs/outputs
    return (db * tm * C_pad * 2            # x tile, bf16
            + db * C_pad * th * 2          # w1 tile, bf16
            + db * th * O_pad * 2          # w2 tile, bf16
            + db * 8 * th * 4              # b1 tile (sublane-padded), f32
            + db * 8 * O_pad * 4           # b2 tile, f32
            + db * tm * O_pad * out_itemsize  # output tile
            + tm * O_pad * 4)              # f32 accumulator scratch (fallback)


def _pick_tiles(M, C_pad, H_pad, O_pad, out_itemsize, token_tile, budget):
    """Pick (tm, th): prefer full-H weight residency, shrink th then tm."""
    tm = max(16, min(_round_up(token_tile, 16), _round_up(M, 16)))
    while True:
        # Largest th that is a multiple of 128, divides H_pad and fits VMEM.
        t = H_pad
        while t >= _LANE:
            if H_pad % t == 0 and _vmem_bytes(tm, t, C_pad, O_pad,
                                              out_itemsize) <= budget:
                return tm, t
            t -= _LANE
        if tm <= 16:
            return 16, _LANE  # last resort: smallest legal tiles
        tm = max(16, _round_up(tm // 2, 16))


# ----------------------------------------------------------------------------
# Kernels
# ----------------------------------------------------------------------------

def _mlp_kernel_resident(x_ref, w1_ref, b1_ref, w2_ref, b2_ref, o_ref, *,
                         approximate_gelu):
    """Full hidden dim resident in VMEM: one fused step per token tile."""
    # fc1: (tm, C) @ (C, H) -> f32 on the MXU.
    h = jnp.dot(x_ref[...], w1_ref[...], preferred_element_type=jnp.float32)
    h = h + b1_ref[...]
    h = jax.nn.gelu(h, approximate=approximate_gelu)
    # fc2: (tm, H) @ (H, O) -> f32, bias added once, single store (no RMW).
    out = jnp.dot(h.astype(w2_ref.dtype), w2_ref[...],
                  preferred_element_type=jnp.float32)
    o_ref[...] = (out + b2_ref[...]).astype(o_ref.dtype)


def _mlp_kernel_htiled(x_ref, w1_ref, b1_ref, w2_ref, b2_ref, o_ref, acc_ref,
                       *, approximate_gelu):
    """Fallback: hidden dim tiled as the last ('arbitrary') grid axis."""
    h_idx = pl.program_id(1)

    @pl.when(h_idx == 0)
    def _init():
        acc_ref[...] = jnp.zeros_like(acc_ref)

    h = jnp.dot(x_ref[...], w1_ref[...], preferred_element_type=jnp.float32)
    h = h + b1_ref[...]
    h = jax.nn.gelu(h, approximate=approximate_gelu)
    acc_ref[...] += jnp.dot(h.astype(w2_ref.dtype), w2_ref[...],
                            preferred_element_type=jnp.float32)

    @pl.when(h_idx == pl.num_programs(1) - 1)
    def _finalize():
        # fc2 bias added exactly once, at finalize.
        o_ref[...] = (acc_ref[...] + b2_ref[...]).astype(o_ref.dtype)


# ----------------------------------------------------------------------------
# Host-side wrappers
# ----------------------------------------------------------------------------

def prepare_mlp_params(w1, b1, w2, b2, *, compute_dtype=jnp.bfloat16):
    """Pad feature dims to lane multiples and cast weights to bf16 ONCE.

    Hoisted out of the per-call path: at call time only the activation is
    padded, avoiding re-reading/re-writing the full f32 weights every call.
    Weights are stored (in, out), i.e. the transpose of nn.Linear's (out, in).
    """
    C, H = w1.shape
    H2, O = w2.shape
    assert H2 == H and b1.shape == (H,) and b2.shape == (O,)
    C_pad = _round_up(C, _LANE)
    H_pad = _round_up(H, _LANE)
    O_pad = _round_up(O, _LANE)
    w1p = jnp.pad(w1, ((0, C_pad - C), (0, H_pad - H))).astype(compute_dtype)
    w2p = jnp.pad(w2, ((0, H_pad - H), (0, O_pad - O))).astype(compute_dtype)
    b1p = jnp.pad(b1, (0, H_pad - H)).reshape(1, H_pad).astype(jnp.float32)
    b2p = jnp.pad(b2, (0, O_pad - O)).reshape(1, O_pad).astype(jnp.float32)
    return {"w1": w1p, "b1": b1p, "w2": w2p, "b2": b2p, "dims": (C, H, O)}


@functools.partial(
    jax.jit,
    static_argnames=("C", "O", "tm", "th", "approximate_gelu", "vmem_limit"))
def _mlp_pallas_impl(x, w1p, b1p, w2p, b2p, *, C, O, tm, th, approximate_gelu,
                     vmem_limit):
    B, N, _ = x.shape
    M = B * N
    C_pad, H_pad = w1p.shape
    O_pad = w2p.shape[1]
    M_pad = _round_up(M, tm)
    out_dtype = x.dtype
    out_isz = jnp.dtype(out_dtype).itemsize

    # Only the activation is padded/cast per call (weights prepared once).
    xp = jnp.pad(x.reshape(M, C),
                 ((0, M_pad - M), (0, C_pad - C))).astype(w1p.dtype)

    m_tiles = M_pad // tm
    h_tiles = H_pad // th

    weight_bytes = (w1p.size * w1p.dtype.itemsize
                    + w2p.size * w2p.dtype.itemsize
                    + b1p.size * b1p.dtype.itemsize
                    + b2p.size * b2p.dtype.itemsize)
    # Weights are re-streamed per token tile only when H is actually tiled.
    weight_passes = m_tiles if h_tiles > 1 else 1
    cost = pl.CostEstimate(
        flops=2 * M_pad * H_pad * (C_pad + O_pad),
        transcendentals=M_pad * H_pad,
        bytes_accessed=(xp.size * xp.dtype.itemsize
                        + weight_bytes * weight_passes
                        + M_pad * O_pad * out_isz),
    )

    if h_tiles == 1:
        # Preferred path: weights fully resident (fetched once, constant block
        # index), no accumulator scratch, single store per output tile.
        kernel = functools.partial(_mlp_kernel_resident,
                                   approximate_gelu=approximate_gelu)
        out2d = pl.pallas_call(
            kernel,
            out_shape=jax.ShapeDtypeStruct((M_pad, O_pad), out_dtype),
            grid_spec=pltpu.PrefetchScalarGridSpec(
                num_scalar_prefetch=0,
                grid=(m_tiles,),
                in_specs=[
                    pl.BlockSpec((tm, C_pad), lambda i: (i, 0)),
                    pl.BlockSpec((C_pad, H_pad), lambda i: (0, 0)),
                    pl.BlockSpec((1, H_pad), lambda i: (0, 0)),
                    pl.BlockSpec((H_pad, O_pad), lambda i: (0, 0)),
                    pl.BlockSpec((1, O_pad), lambda i: (0, 0)),
                ],
                out_specs=pl.BlockSpec((tm, O_pad), lambda i: (i, 0)),
            ),
            compiler_params=pltpu.CompilerParams(
                dimension_semantics=("parallel",),
                vmem_limit_bytes=vmem_limit),
            cost_estimate=cost,
        )(xp, w1p, b1p, w2p, b2p)
    else:
        # Fallback: tile the hidden dim, accumulate fc2 partials in f32.
        kernel = functools.partial(_mlp_kernel_htiled,
                                   approximate_gelu=approximate_gelu)
        out2d = pl.pallas_call(
            kernel,
            out_shape=jax.ShapeDtypeStruct((M_pad, O_pad), out_dtype),
            grid_spec=pltpu.PrefetchScalarGridSpec(
                num_scalar_prefetch=0,
                grid=(m_tiles, h_tiles),
                in_specs=[
                    # x tile: constant along the H axis -> stays resident.
                    pl.BlockSpec((tm, C_pad), lambda i, h: (i, 0)),
                    pl.BlockSpec((C_pad, th), lambda i, h: (0, h)),
                    pl.BlockSpec((1, th), lambda i, h: (0, h)),
                    pl.BlockSpec((th, O_pad), lambda i, h: (h, 0)),
                    pl.BlockSpec((1, O_pad), lambda i, h: (0, 0)),
                ],
                out_specs=pl.BlockSpec((tm, O_pad), lambda i, h: (i, 0)),
                scratch_shapes=[pltpu.VMEM((tm, O_pad), jnp.float32)],
            ),
            compiler_params=pltpu.CompilerParams(
                dimension_semantics=("parallel", "arbitrary"),
                vmem_limit_bytes=vmem_limit),
            cost_estimate=cost,
        )(xp, w1p, b1p, w2p, b2p)

    return out2d[:M, :O].reshape(B, N, O)


def mlp_pallas(x, params, *, token_tile=512, approximate_gelu=True):
    """Fused MLP forward. x: (B, N, C); params from prepare_mlp_params()."""
    C, H, O = params["dims"]
    assert x.shape[-1] == C
    w1p, b1p, w2p, b2p = params["w1"], params["b1"], params["w2"], params["b2"]
    C_pad, H_pad = w1p.shape
    O_pad = w2p.shape[1]
    M = x.shape[0] * x.shape[1]

    budget = _vmem_budget_bytes()
    tm, th = _pick_tiles(M, C_pad, H_pad, O_pad,
                         jnp.dtype(x.dtype).itemsize, token_tile, budget)
    return _mlp_pallas_impl(x, w1p, b1p, w2p, b2p, C=C, O=O, tm=tm, th=th,
                            approximate_gelu=approximate_gelu,
                            vmem_limit=budget)


def reference_mlp(x, w1, b1, w2, b2, *, approximate_gelu=False):
    h = jnp.einsum("bnc,ch->bnh", x, w1) + b1
    h = jax.nn.gelu(h, approximate=approximate_gelu)
    return jnp.einsum("bnh,ho->bno", h, w2) + b2


if __name__ == "__main__":
    # Small shapes consistent with the module: batch=2, seq=8,
    # in_features=32, hidden_features=64, out_features=32.
    B, N, C, Hd = 2, 8, 32, 64
    key = jax.random.PRNGKey(0)
    kx, kw1, kb1, kw2, kb2 = jax.random.split(key, 5)

    x = jax.random.normal(kx, (B, N, C), dtype=jnp.float32)
    # deterministic parameter init (synthetic, not a checkpoint load)
    w1 = jax.random.normal(kw1, (C, Hd), dtype=jnp.float32) * 0.02
    b1 = jax.random.normal(kb1, (Hd,), dtype=jnp.float32) * 0.01
    w2 = jax.random.normal(kw2, (Hd, C), dtype=jnp.float32) * 0.02
    b2 = jax.random.normal(kb2, (C,), dtype=jnp.float32) * 0.01

    params = prepare_mlp_params(w1, b1, w2, b2)

    # Default (performance) configuration: tanh GELU (EUP slot).
    out_fast = jax.block_until_ready(
        mlp_pallas(x, params, approximate_gelu=True))
    ref_fast = reference_mlp(x, w1, b1, w2, b2, approximate_gelu=True)
    assert out_fast.shape == (B, N, C)
    assert jnp.allclose(out_fast, ref_fast, atol=2e-3, rtol=2e-2), \
        "mismatch vs tanh-GELU reference"

    # Exact erf GELU = PyTorch nn.GELU() default (parity-checked too).
    out_exact = jax.block_until_ready(
        mlp_pallas(x, params, approximate_gelu=False))
    ref_exact = reference_mlp(x, w1, b1, w2, b2, approximate_gelu=False)
    assert jnp.allclose(out_exact, ref_exact, atol=2e-3, rtol=2e-2), \
        "mismatch vs erf-GELU reference"

    print("KERNEL_OK")
</pallas_src>

<mosaic_0001>
module attributes {stable_mosaic.version = 11 : i64} {
  func.func @_mlp_kernel_resident(%arg0: i32, %arg1: memref<16x128xbf16, #tpu.memory_space<vmem>>, %arg2: memref<128x128xbf16, #tpu.memory_space<vmem>>, %arg3: memref<1x128xf32, #tpu.memory_space<vmem>>, %arg4: memref<128x128xbf16, #tpu.memory_space<vmem>>, %arg5: memref<1x128xf32, #tpu.memory_space<vmem>>, %arg6: memref<16x128xf32, #tpu.memory_space<vmem>>) attributes {dimension_semantics = [#tpu.dimension_semantics<parallel>], iteration_bounds = array<i64: 1>, scalar_prefetch = 0 : i64, scratch_operands = 0 : i64, tpu.core_type = #tpu.core_type<tc>, window_params = [{transform_indices = @transform_0, window_bounds = array<i64: 16, 128>}, {pipeline_mode = #tpu.pipeline_mode<synchronous>, transform_indices = @transform_1, window_bounds = array<i64: 128, 128>}, {pipeline_mode = #tpu.pipeline_mode<synchronous>, transform_indices = @transform_2, window_bounds = array<i64: 1, 128>}, {pipeline_mode = #tpu.pipeline_mode<synchronous>, transform_indices = @transform_3, window_bounds = array<i64: 128, 128>}, {pipeline_mode = #tpu.pipeline_mode<synchronous>, transform_indices = @transform_4, window_bounds = array<i64: 1, 128>}, {transform_indices = @transform_5, window_bounds = array<i64: 16, 128>}]} {
    %c0 = arith.constant 0 : index
    %c0_0 = arith.constant 0 : index
    %0 = vector.load %arg1[%c0, %c0_0] : memref<16x128xbf16, #tpu.memory_space<vmem>>, vector<16x128xbf16>
    %c0_1 = arith.constant 0 : index
    %c0_2 = arith.constant 0 : index
    %1 = vector.load %arg2[%c0_1, %c0_2] : memref<128x128xbf16, #tpu.memory_space<vmem>>, vector<128x128xbf16>
    %cst = arith.constant dense<0.000000e+00> : vector<16x128xf32>
    %2 = tpu.matmul %0, %1, %cst {dimension_numbers = #tpu.dot_dimension_numbers<[1], [0], [0], [1], [0, 0, 1, 1], [], []>} : vector<16x128xbf16>, vector<128x128xbf16>, vector<16x128xf32> -> vector<16x128xf32>
    %c0_3 = arith.constant 0 : index
    %c0_4 = arith.constant 0 : index
    %3 = vector.load %arg3[%c0_3, %c0_4] : memref<1x128xf32, #tpu.memory_space<vmem>>, vector<1x128xf32>
    %4 = vector.broadcast %3 : vector<1x128xf32> to vector<16x128xf32>
    %5 = arith.addf %2, %4 : vector<16x128xf32>
    %6 = arith.mulf %5, %5 : vector<16x128xf32>
    %7 = arith.mulf %5, %6 : vector<16x128xf32>
    %cst_5 = arith.constant 4.471500e-02 : f32
    %8 = vector.broadcast %cst_5 : f32 to vector<16x128xf32>
    %9 = arith.mulf %8, %7 : vector<16x128xf32>
    %10 = arith.addf %5, %9 : vector<16x128xf32>
    %cst_6 = arith.constant 0.797884583 : f32
    %11 = vector.broadcast %cst_6 : f32 to vector<16x128xf32>
    %12 = arith.mulf %11, %10 : vector<16x128xf32>
    %13 = math.tanh %12 : vector<16x128xf32>
    %cst_7 = arith.constant 1.000000e+00 : f32
    %14 = vector.broadcast %cst_7 : f32 to vector<16x128xf32>
    %15 = arith.addf %14, %13 : vector<16x128xf32>
    %cst_8 = arith.constant 5.000000e-01 : f32
    %16 = vector.broadcast %cst_8 : f32 to vector<16x128xf32>
    %17 = arith.mulf %16, %15 : vector<16x128xf32>
    %18 = arith.mulf %5, %17 : vector<16x128xf32>
    %19 = arith.truncf %18 : vector<16x128xf32> to vector<16x128xbf16>
    %c0_9 = arith.constant 0 : index
    %c0_10 = arith.constant 0 : index
    %20 = vector.load %arg4[%c0_9, %c0_10] : memref<128x128xbf16, #tpu.memory_space<vmem>>, vector<128x128xbf16>
    %cst_11 = arith.constant dense<0.000000e+00> : vector<16x128xf32>
    %21 = tpu.matmul %19, %20, %cst_11 {dimension_numbers = #tpu.dot_dimension_numbers<[1], [0], [0], [1], [0, 0, 1, 1], [], []>} : vector<16x128xbf16>, vector<128x128xbf16>, vector<16x128xf32> -> vector<16x128xf32>
    %c0_12 = arith.constant 0 : index
    %c0_13 = arith.constant 0 : index
    %22 = vector.load %arg5[%c0_12, %c0_13] : memref<1x128xf32, #tpu.memory_space<vmem>>, vector<1x128xf32>
    %23 = vector.broadcast %22 : vector<1x128xf32> to vector<16x128xf32>
    %24 = arith.addf %21, %23 : vector<16x128xf32>
    %c0_14 = arith.constant 0 : index
    %c0_15 = arith.constant 0 : index
    %25 = vector.load %arg6[%c0_14, %c0_15] : memref<16x128xf32, #tpu.memory_space<vmem>>, vector<16x128xf32>
    tpu.vector_store %arg6[%c0_14, %c0_15], %24 {strides = array<i32>} : memref<16x128xf32, #tpu.memory_space<vmem>>, vector<16x128xf32>,
    return
  }
  func.func @transform_0(%arg0: i32) -> (i32, i32) {
    %c0_i32 = arith.constant 0 : i32
    %c0_i32_0 = arith.constant 0 : i32
    return %arg0, %c0_i32 : i32, i32
  }
  func.func @transform_1(%arg0: i32) -> (i32, i32) {
    %c0_i32 = arith.constant 0 : i32
    %c0_i32_0 = arith.constant 0 : i32
    %c0_i32_1 = arith.constant 0 : i32
    return %c0_i32, %c0_i32_0 : i32, i32
  }
  func.func @transform_2(%arg0: i32) -> (i32, i32) {
    %c0_i32 = arith.constant 0 : i32
    %c0_i32_0 = arith.constant 0 : i32
    %c0_i32_1 = arith.constant 0 : i32
    return %c0_i32, %c0_i32_0 : i32, i32
  }
  func.func @transform_3(%arg0: i32) -> (i32, i32) {
    %c0_i32 = arith.constant 0 : i32
    %c0_i32_0 = arith.constant 0 : i32
    %c0_i32_1 = arith.constant 0 : i32
    return %c0_i32, %c0_i32_0 : i32, i32
  }
  func.func @transform_4(%arg0: i32) -> (i32, i32) {
    %c0_i32 = arith.constant 0 : i32
    %c0_i32_0 = arith.constant 0 : i32
    %c0_i32_1 = arith.constant 0 : i32
    return %c0_i32, %c0_i32_0 : i32, i32
  }
  func.func @transform_5(%arg0: i32) -> (i32, i32) {
    %c0_i32 = arith.constant 0 : i32
    %c0_i32_0 = arith.constant 0 : i32
    return %arg0, %c0_i32 : i32, i32
  }
}

</mosaic_0001>

<bundles_post_ra>
// kernel: _mlp_pallas_impl.1
= control target key start
LH: loop header
LB: loop body
LE: loop exit
PB: predicated region body
PF: predicated region fallthrough
CT: control target
= control target key end

     0   :  { %10 = vsyncpa [#allocation3], 0  ;;  %s535_s0 = inlined_call_operand.vmem [shape: bf16[16,128], index: 0, kind: input, shape index: {}]   ;;  %s536_s1 = inlined_call_operand.hbm [shape: bf16[128,128], index: 1, kind: input, shape index: {}]   ;;  %s537_s2 = inlined_call_operand.vmem [shape: f32[1,128], index: 2, kind: input, shape index: {}]   ;;  %s538_s3 = inlined_call_operand.hbm [shape: bf16[128,128], index: 3, kind: input, shape index: {}]   ;;  %s539_s4 = inlined_call_operand.vmem [shape: f32[1,128], index: 4, kind: input, shape index: {}]   ;;  %s540_s5 = inlined_call_operand.vmem [shape: f32[16,128], index: 5, kind: output, shape index: {}]  }
   0x1   :  { %11 = vsyncpa [#allocation5], 0  ;;  %s460_s18 = smov [#allocation2]   ;;  %s412_s22 = scalar_lea.hbm %s536_s1, 1024 }
   0x2   :  { %s19_s19 = sshll.u32 %s460_s18, 4  ;;  %p413_p0 = scmp.ne.s32.totalorder %s536_s1, %s412_s22  ;;  %s20_s19 = int_to_ptr.vmem [resolvable:$true] %s19_s19 }
   0x3   :  { %p416_p1 = scmp.lt.u32.totalorder %s412_s22, %s536_s1 }
   0x5   :  { %p418_p2 = pnand %p416_p1, %p413_p0 }
   0x7   :  { %421 = shalt.err (!%p418_p2)
}
   0x8   :  { %s422_s27 = scalar_lea.vmem %s20_s19, 1024  ;;  %p427_p4 = scmp.lt.s32.totalorder %s20_s19, %s20_s19 }
   0x9   :  { %p423_p3 = scmp.ne.s32.totalorder %s20_s19, %s422_s27  ;;  %p428_p5 = scmp.lt.s32.totalorder %s422_s27, %s422_s27 }
   0xb   :  { %p429_p6 = por %p428_p5, %p427_p4 }
   0xd   :  { %p430_p7 = pnand %p429_p6, %p423_p3 }
   0xf   :  { %433 = shalt.err (!%p430_p7)
}
  0x10   :  { %s461_s28 = smov 64   ;;  %s462_s29 = smov 4  }
  0x11   :  { %25 = dma.hbm_to_vmem [thread:$0]  %s536_s1, 1024, %s20_s19, [#allocation3], %s461_s28, %s461_s28, %s462_s29  }
  0x12   :  { %s463_s7 = smov [#allocation4]   ;;  %s434_s11 = scalar_lea.hbm %s538_s3, 1024 }
  0x13   :  { %s33_s8 = sshll.u32 %s463_s7, 4  ;;  %p435_p8 = scmp.ne.s32.totalorder %s538_s3, %s434_s11  ;;  %s34_s8 = int_to_ptr.vmem [resolvable:$true] %s33_s8 }
  0x14   :  { %p438_p9 = scmp.lt.u32.totalorder %s434_s11, %s538_s3 }
  0x16   :  { %p440_p10 = pnand %p438_p9, %p435_p8 }
  0x18   :  { %443 = shalt.err (!%p440_p10)
}
  0x19   :  { %s444_s16 = scalar_lea.vmem %s34_s8, 1024  ;;  %p449_p12 = scmp.lt.s32.totalorder %s34_s8, %s34_s8 }
  0x1a   :  { %p445_p11 = scmp.ne.s32.totalorder %s34_s8, %s444_s16  ;;  %p450_p13 = scmp.lt.s32.totalorder %s444_s16, %s444_s16 }
  0x1c   :  { %p451_p0 = por %p450_p13, %p449_p12 }
  0x1e   :  { %p452_p1 = pnand %p451_p0, %p445_p11 }
  0x20   :  { %455 = shalt.err (!%p452_p1)
}
  0x21   :  { %39 = dma.hbm_to_vmem [thread:$0]  %s538_s3, 1024, %s34_s8, [#allocation5], %s461_s28, %s461_s28, %s462_s29  }
  0x22   :  { %456 = dma.done.wait [#allocation3], 1024  }
  0x23   :  { %457 = vsyncadd [#allocation3], 4294966272 }
  0x24   :  { %458 = dma.done.wait [#allocation5], 1024  }
  0x25   :  { %459 = vsyncadd [#allocation5], 4294966272  ;;  %v464_v0 = vmov 0.0   ;;  %vm465_vm0 = vmmov 0   ;;  %v391_v1 = vld [vmem:[#allocation2] sm:$0xff]   ;;  %v392_v2 = vld [vmem:[#allocation2 + $0x8] sm:$0xff]  }
  0x26   :  { %345 = vmatprep.subr.bf16.mxu0 %v464_v0  ;;  %361 = vmatprep.mubr.msk.bf16.mxu0 %vm465_vm0, %v464_v0  ;;  %v393_v3 = vld [vmem:[#allocation2 + $0x10] sm:$0xff]   ;;  %v394_v4 = vld [vmem:[#allocation2 + $0x18] sm:$0xff]   ;;  %v395_v5 = vld [vmem:[#allocation2 + $0x20] sm:$0xff]  }
  0x27   :  { %365 = vmatprep.subr.bf16.mxu1 %v464_v0  ;;  %381 = vmatprep.mubr.msk.bf16.mxu1 %vm465_vm0, %v464_v0  ;;  %v396_v6 = vld [vmem:[#allocation2 + $0x28] sm:$0xff]   ;;  %v397_v7 = vld [vmem:[#allocation2 + $0x30] sm:$0xff]   ;;  %v398_v8 = vld [vmem:[#allocation2 + $0x38] sm:$0xff]  }
  0x28   :  { %346 = vmatpush3.bf16.msra.mxu0 %v391_v1  ;;  %v399_v9 = vld [vmem:[%s535_s0] sm:$0xff]   ;;  %v401_v11 = vld [vmem:[#allocation4 + $0x8] sm:$0xff]   ;;  %v402_v12 = vld [vmem:[#allocation4 + $0x10] sm:$0xff]  }
  0x29   :  { %347 = vmatprep.subr.bf16.mxu0 %v464_v0  ;;  %v400_v10 = vld [vmem:[#allocation4] sm:$0xff]   ;;  %v403_v13 = vld [vmem:[#allocation4 + $0x18] sm:$0xff]   ;;  %v405_v15 = vld [vmem:[#allocation4 + $0x28] sm:$0xff]  }
  0x2a   :  { %366 = vmatpush3.bf16.msra.mxu1 %v400_v10  ;;  %v404_v14 = vld [vmem:[#allocation4 + $0x20] sm:$0xff]   ;;  %v406_v16 = vld [vmem:[#allocation4 + $0x30] sm:$0xff]   ;;  %v407_v17 = vld [vmem:[#allocation4 + $0x38] sm:$0xff]  }
  0x2b   :  { %367 = vmatprep.subr.bf16.mxu1 %v464_v0  ;;  %v308_v18 = vld [vmem:[%s537_s2] ss:$0 sm:$0xff] }
  0x2c   :  { %348 = vmatpush3.bf16.msra.mxu0 %v392_v2  ;;  %v318_v44 = vld [vmem:[%s539_s4] ss:$0 sm:$0xff] }
  0x2d   :  { %349 = vmatprep.subr.bf16.mxu0 %v464_v0 }
  0x2e   :  { %368 = vmatpush3.bf16.msra.mxu1 %v401_v11 }
  0x2f   :  { %369 = vmatprep.subr.bf16.mxu1 %v464_v0 }
  0x30   :  { %350 = vmatpush3.bf16.msra.mxu0 %v393_v3 }
  0x31   :  { %351 = vmatprep.subr.bf16.mxu0 %v464_v0 }
  0x32   :  { %370 = vmatpush3.bf16.msra.mxu1 %v402_v12 }
  0x33   :  { %371 = vmatprep.subr.bf16.mxu1 %v464_v0 }
  0x34   :  { %352 = vmatpush3.bf16.msra.mxu0 %v394_v4 }
  0x35   :  { %353 = vmatprep.subr.bf16.mxu0 %v464_v0 }
  0x36   :  { %372 = vmatpush3.bf16.msra.mxu1 %v403_v13 }
  0x37   :  { %373 = vmatprep.subr.bf16.mxu1 %v464_v0 }
  0x38   :  { %354 = vmatpush3.bf16.msra.mxu0 %v395_v5 }
  0x39   :  { %355 = vmatprep.subr.bf16.mxu0 %v464_v0 }
  0x3a   :  { %374 = vmatpush3.bf16.msra.mxu1 %v404_v14 }
  0x3b   :  { %375 = vmatprep.subr.bf16.mxu1 %v464_v0 }
  0x3c   :  { %356 = vmatpush3.bf16.msra.mxu0 %v396_v6 }
  0x3d   :  { %357 = vmatprep.subr.bf16.mxu0 %v464_v0 }
  0x3e   :  { %376 = vmatpush3.bf16.msra.mxu1 %v405_v15 }
  0x3f   :  { %377 = vmatprep.subr.bf16.mxu1 %v464_v0 }
  0x40   :  { %358 = vmatpush3.bf16.msra.mxu0 %v397_v7 }
  0x41   :  { %359 = vmatprep.subr.bf16.mxu0 %v464_v0 }
  0x42   :  { %378 = vmatpush3.bf16.msra.mxu1 %v406_v16 }
  0x43   :  { %379 = vmatprep.subr.bf16.mxu1 %v464_v0 }
  0x44   :  { %360 = vmatpush3.bf16.msra.mxu0 %v398_v8 }
  0x46   :  { %380 = vmatpush3.bf16.msra.mxu1 %v407_v17 }
  0x47   :  { %362 = vmatmul.mubr.bf16.vlgmr.msra.gmra.mrb[0].mxu0 %v399_v9 }
 0x11a   :  { %v162_v19 = vpop.f32.mrb[0].mxu0 }
 0x11b   :  { %v163_v20 = vadd.f32 %v308_v18, %v162_v19  ;;  %v363_v21 = vpop.f32.mrb[1].mxu0 }
 0x11c   :  { %v165_v22 = vpop.f32.mrb[2].mxu0 }
 0x11d   :  { %v169_v23 = vmul.f32 %v163_v20, %v163_v20  ;;  %v166_v24 = vadd.f32 %v308_v18, %v165_v22  ;;  %v364_v25 = vpop.f32.mrb[3].mxu0 }
 0x11f   :  { %v171_v26 = vmul.f32 %v169_v23, %v163_v20  ;;  %v170_v27 = vmul.f32 %v166_v24, %v166_v24 }
 0x121   :  { %v173_v28 = vmul.f32 0.044715, %v171_v26  ;;  %v172_v29 = vmul.f32 %v170_v27, %v166_v24 }
 0x123   :  { %v175_v30 = vadd.f32 %v173_v28, %v163_v20  ;;  %v174_v31 = vmul.f32 0.044715, %v172_v29 }
 0x125   :  { %v177_v32 = vmul.f32 0.7978846, %v175_v30  ;;  %v176_v33 = vadd.f32 %v174_v31, %v166_v24 }
 0x127   :  { %408 = vtanh.f32 %v177_v32  ;;  %v178_v34 = vmul.f32 0.7978846, %v176_v33 }
 0x129   :  { %410 = vtanh.f32 %v178_v34 }
 0x131   :  { %v409_v35 = vpop.eup %408 }
 0x132   :  { %v181_v36 = vadd.f32 1.0, %v409_v35 }
 0x133   :  { %v411_v37 = vpop.eup %410 }
 0x134   :  { %v182_v38 = vadd.f32 1.0, %v411_v37  ;;  %v183_v39 = vmul.f32 0.5, %v181_v36 }
 0x136   :  { %v184_v40 = vmul.f32 0.5, %v182_v38  ;;  %v185_v41 = vmul.f32 %v183_v39, %v163_v20 }
 0x138   :  { %v186_v42 = vmul.f32 %v184_v40, %v166_v24 }
 0x13a   :  { %v187_v43 = vpack.c.bf16 %v186_v42, %v185_v41 }
 0x13c   :  { %382 = vmatmul.mubr.bf16.vlgmr.msra.gmra.mrb[0].mxu1 %v187_v43 }
 0x20f   :  { %v293_v45 = vpop.f32.mrb[0].mxu1 }
 0x210   :  { %v294_v46 = vadd.f32 %v318_v44, %v293_v45  ;;  %v383_v47 = vpop.f32.mrb[1].mxu1 }
 0x211   :  { %v296_v48 = vpop.f32.mrb[2].mxu1 }
 0x212   :  { %300 = vst [vmem:[%s540_s5] sm:$0xff] %v294_v46  ;;  %v297_v49 = vadd.f32 %v318_v44, %v296_v48  ;;  %v384_v50 = vpop.f32.mrb[3].mxu1 }
 0x214   :  { %301 = vst [vmem:[%s540_s5 + $0x8] sm:$0xff] %v297_v49 }
 0x215   :  { %306 = vsyncpa [#allocation3], 1 }
 0x216   :  { %307 = vsyncpa [#allocation5], 1 }

</bundles_post_ra>
